<compile_context>
chip_gen: v7x
topology: tpu7x:2x2x1
jax: 0.10.0
libtpu: 0.0.40
codegen_flags: <defaults>
</compile_context>

<pallas_src>
import functools
import math

import jax
import jax.numpy as jnp
from jax.experimental import pallas as pl
from jax.experimental.pallas import tpu as pltpu


# ---------------------------------------------------------------------------
# Pallas kernel: fused per-batch reductions for BCE-with-logits and IoU.
# ---------------------------------------------------------------------------
def _make_bce_iou_kernel(tr, num_rows, chunks_per_split, needs_mask):
    """Builds the reduction kernel over (1, tr, 128) blocks of (logits, target).

    Accumulates, per batch element, into a (3, 8, 128) f32 output block:
      slot 0: sum(sigmoid(x) * t)           (IoU intersection)
      slot 1: sum(sigmoid(x) + t)           (intersection + union)
      slot 2: sum(BCE-with-logits(x, t))    (elementwise, un-normalized)
    """

    def kernel(logit_ref, target_ref, out_ref):
        c = pl.program_id(2)

        @pl.when(c == 0)
        def _init():
            out_ref[...] = jnp.zeros_like(out_ref)

        x = logit_ref[0].astype(jnp.float32)      # (tr, 128)
        t = target_ref[0].astype(jnp.float32)

        p = 1.0 / (1.0 + jnp.exp(-x))             # sigmoid
        inter = p * t
        union = p + t
        # Numerically stable BCE-with-logits: max(x,0) - x*t + log(1 + e^-|x|)
        bce = jnp.maximum(x, 0.0) - x * t + jnp.log(1.0 + jnp.exp(-jnp.abs(x)))

        if needs_mask:
            # Ragged last chunk: rows at/above `num_rows` come from the
            # unspecified out-of-bounds block padding -> zero them out.
            g = pl.program_id(0) * chunks_per_split + c
            row = jax.lax.broadcasted_iota(jnp.int32, (tr, 128), 0)
            valid = (g * tr + row) < num_rows
            inter = jnp.where(valid, inter, 0.0)
            union = jnp.where(valid, union, 0.0)
            bce = jnp.where(valid, bce, 0.0)

        if tr % 8 == 0:
            # Fold (tr, 128) -> (8, 128) with pure VPU adds (vreg-group sum);
            # the cross-lane reduce happens once, outside the kernel.
            def vsum(v):
                return jnp.sum(v.reshape(tr // 8, 8, 128), axis=0)

            out_ref[0, 0] += vsum(inter)
            out_ref[0, 1] += vsum(union)
            out_ref[0, 2] += vsum(bce)
        else:
            # Tiny-input fallback (tr equals the full row count, not a
            # multiple of 8): one sublane reduce per quantity.
            out_ref[0, 0, 0:1] += jnp.sum(inter, axis=0, keepdims=True)
            out_ref[0, 1, 0:1] += jnp.sum(union, axis=0, keepdims=True)
            out_ref[0, 2, 0:1] += jnp.sum(bce, axis=0, keepdims=True)

    return kernel


def _bce_iou_sums(logits, target, *, tile_rows=1024):
    """One fused streaming pass over (logits, target).

    Returns (s_inter, s_union, s_bce), each of shape (batch,):
      s_inter[i] = sum(sigmoid(x_i) * t_i)
      s_union[i] = sum(sigmoid(x_i) + t_i)
      s_bce[i]   = sum over elements of BCE-with-logits(x_i, t_i)
    Inputs may be f32 or bf16; accumulation is always f32.
    """
    assert logits.shape == target.shape
    assert tile_rows % 8 == 0
    b = logits.shape[0]
    n = math.prod(logits.shape[1:])

    lx = jnp.reshape(logits, (b, n))
    tx = jnp.reshape(target, (b, n))
    if n % 128 != 0:
        # TODO(synk): lane-level in-kernel masking would avoid this copy; the
        # fill values make the padded tail contribute exactly zero to every
        # accumulated sum (sigmoid(-1e30) == 0, BCE(-1e30, 0) == 0).
        pad = (-n) % 128
        lx = jnp.pad(lx, ((0, 0), (0, pad)), constant_values=-1e30)
        tx = jnp.pad(tx, ((0, 0), (0, pad)), constant_values=0.0)
    r = lx.shape[1] // 128
    lx = lx.reshape(b, r, 128)
    tx = tx.reshape(b, r, 128)

    tr = r if r <= tile_rows else tile_rows
    num_chunks = pl.cdiv(r, tr)
    # With a tiny batch, split the chunk axis so both TensorCores of a dual-TC
    # chip (v7x) stream HBM; the per-split partials are summed in JAX.
    splits = 2 if (b <= 2 and num_chunks >= 2 and num_chunks % 2 == 0) else 1
    cps = num_chunks // splits
    needs_mask = num_chunks * tr > r

    kernel = _make_bce_iou_kernel(tr, r, cps, needs_mask)
    out = pl.pallas_call(
        kernel,
        out_shape=jax.ShapeDtypeStruct((splits * b, 3, 8, 128), jnp.float32),
        grid_spec=pltpu.PrefetchScalarGridSpec(
            num_scalar_prefetch=0,
            grid=(splits, b, cps),
            # Default double-buffering; bump pipeline_mode=pl.Buffered(3) only
            # if a trace ever shows exposed DMA at small tiles.
            in_specs=[
                pl.BlockSpec((1, tr, 128), lambda s, i, c: (i, s * cps + c, 0)),
                pl.BlockSpec((1, tr, 128), lambda s, i, c: (i, s * cps + c, 0)),
            ],
            out_specs=pl.BlockSpec((1, 3, 8, 128),
                                   lambda s, i, c: (s * b + i, 0, 0, 0)),
        ),
        compiler_params=pltpu.CompilerParams(
            dimension_semantics=("parallel", "parallel", "arbitrary"),
            vmem_limit_bytes=32 * 1024 * 1024,
        ),
    )(lx, tx)

    sums = jnp.sum(out.reshape(splits, b, 3, 8 * 128), axis=(0, 3))  # (b, 3)
    return sums[:, 0], sums[:, 1], sums[:, 2]


# ---------------------------------------------------------------------------
# MS-SSIM pyramid (JAX glue; mirrors ssim/msssim from models/unet3/loss.py).
# TODO(synk): the SSIM pyramid (depthwise Gaussian convs + 2x2 avg-pools on a
# shrinking image) is left to XLA rather than hand-written Pallas.
# ---------------------------------------------------------------------------
_MSSSIM_WEIGHTS = (0.0448, 0.2856, 0.3001, 0.2363, 0.1333)


def _gaussian_window_2d(size, sigma=1.5):
    x = jnp.arange(size, dtype=jnp.float32) - (size // 2)
    g = jnp.exp(-(x ** 2) / (2.0 * sigma ** 2))
    g = g / jnp.sum(g)
    return jnp.outer(g, g)


def _ssim(img1, img2, window_size=11):
    # val_range=None branch of the torch code.
    max_val = jnp.where(jnp.max(img1) > 128.0, 255.0, 1.0)
    min_val = jnp.where(jnp.min(img1) < -0.5, -1.0, 0.0)
    big_l = max_val - min_val

    _, c, h, w = img1.shape
    real = min(window_size, h, w)
    kernel = jnp.broadcast_to(_gaussian_window_2d(real), (c, 1, real, real))

    def dconv(x):
        return jax.lax.conv_general_dilated(
            x, kernel, window_strides=(1, 1), padding="VALID",
            dimension_numbers=("NCHW", "OIHW", "NCHW"),
            feature_group_count=c, precision=jax.lax.Precision.HIGHEST)

    mu1 = dconv(img1)
    mu2 = dconv(img2)
    mu1_sq, mu2_sq, mu1_mu2 = mu1 * mu1, mu2 * mu2, mu1 * mu2
    sigma1_sq = dconv(img1 * img1) - mu1_sq
    sigma2_sq = dconv(img2 * img2) - mu2_sq
    sigma12 = dconv(img1 * img2) - mu1_mu2

    c1 = (0.01 * big_l) ** 2
    c2 = (0.03 * big_l) ** 2
    v1 = 2.0 * sigma12 + c2
    v2 = sigma1_sq + sigma2_sq + c2
    cs = jnp.mean(v1 / v2)
    ssim_map = ((2.0 * mu1_mu2 + c1) * v1) / ((mu1_sq + mu2_sq + c1) * v2)
    return jnp.mean(ssim_map), cs


def _avg_pool2(x):
    s = jax.lax.reduce_window(x, 0.0, jax.lax.add,
                              window_dimensions=(1, 1, 2, 2),
                              window_strides=(1, 1, 2, 2),
                              padding="VALID")
    return s * 0.25


def _msssim(img1, img2, window_size=11):
    weights = jnp.array(_MSSSIM_WEIGHTS, jnp.float32)
    mssim, mcs = [], []
    for _ in range(len(_MSSSIM_WEIGHTS)):
        sim, cs = _ssim(img1, img2, window_size)
        mssim.append(sim)
        mcs.append(cs)
        img1 = _avg_pool2(img1)
        img2 = _avg_pool2(img2)
    mssim = jnp.stack(mssim)
    mcs = jnp.stack(mcs)
    pow1 = mcs ** weights
    pow2 = mssim ** weights
    # Exactly mirrors the torch expression torch.prod(pow1[:-1] * pow2[-1]).
    return jnp.prod(pow1[:-1] * pow2[-1])


# ---------------------------------------------------------------------------
# Full module forward: BCEWithIoUAndSSIM.
# ---------------------------------------------------------------------------
@functools.partial(jax.jit, static_argnames=("tile_rows",))
def bce_with_iou_and_ssim_loss(pred_logits, target, *, tile_rows=1024):
    b = pred_logits.shape[0]
    n = math.prod(pred_logits.shape[1:])

    s_inter, s_union, s_bce = _bce_iou_sums(pred_logits, target,
                                            tile_rows=tile_rows)
    bce = jnp.sum(s_bce) / (b * n)          # BCEWithLogitsLoss (mean reduction)
    ior = s_union - s_inter                 # sum(p) + sum(t) - sum(p*t)
    # Note: ior == 0 (all-zero pred & target) gives NaN, same as the torch code.
    iou = jnp.mean(1.0 - s_inter / ior)     # IOU_loss(sigmoid(pred), target)

    p = jax.nn.sigmoid(pred_logits.astype(jnp.float32))
    mss = jnp.clip(1.0 - _msssim(p, target.astype(jnp.float32)), 0.0, 1.0)

    losses = jnp.stack([bce, iou, mss])
    # dynamic_weights(): the torch module detaches via .item(); mirror with
    # stop_gradient (forward value identical).
    w = 1.0 / (jax.lax.stop_gradient(losses) + 1e-6)
    w = w / jnp.sum(w)
    return jnp.sum(w * losses)


# ---------------------------------------------------------------------------
# Pure-JAX reference (no Pallas) mirroring the PyTorch module.
# ---------------------------------------------------------------------------
def _reference_loss(pred_logits, target):
    x = pred_logits.astype(jnp.float32)
    t = target.astype(jnp.float32)

    bce = jnp.mean(jnp.maximum(x, 0.0) - x * t +
                   jnp.log1p(jnp.exp(-jnp.abs(x))))

    p = jax.nn.sigmoid(x)
    b = x.shape[0]
    iou = 0.0
    for i in range(b):                      # mirrors the per-sample loop in _iou
        iand = jnp.sum(t[i] * p[i])
        ior = jnp.sum(t[i]) + jnp.sum(p[i]) - iand
        iou = iou + (1.0 - iand / ior)
    iou = iou / b

    mss = jnp.clip(1.0 - _msssim(p, t), 0.0, 1.0)

    losses = jnp.stack([bce, iou, mss])
    w = 1.0 / (losses + 1e-6)
    w = w / jnp.sum(w)
    return jnp.sum(w * losses)


if __name__ == "__main__":
    key = jax.random.PRNGKey(0)
    k1, k2 = jax.random.split(key)
    # (B, C, H, W). Spatial >= 32 so the 5-level MS-SSIM pyramid of the
    # original module (five 2x2 avg-pools) is well defined.
    shape = (2, 4, 32, 32)
    target = (jax.random.uniform(k2, shape) > 0.5).astype(jnp.float32)
    # Logits correlated with the target (as a segmentation head would emit);
    # pure-noise logits can make the MS-SSIM `cs` term negative, which the
    # original torch module would also turn into NaN via the fractional power.
    pred = 6.0 * (target - 0.5) + jax.random.normal(k1, shape, jnp.float32)

    ref = jax.block_until_ready(_reference_loss(pred, target))

    # 1) Default tiling (single chunk per batch element at this size).
    out = jax.block_until_ready(
        bce_with_iou_and_ssim_loss(pred, target, tile_rows=1024))
    assert jnp.allclose(out, ref, rtol=2e-4, atol=2e-5), (out, ref)

    # 2) Small tiles: exercises the chunked accumulation (pl.when init +
    #    revisited output block) and the dual-TensorCore split of the chunk axis.
    out_chunked = jax.block_until_ready(
        bce_with_iou_and_ssim_loss(pred, target, tile_rows=8))
    assert jnp.allclose(out_chunked, ref, rtol=2e-4, atol=2e-5), (out_chunked, ref)

    # 3) bf16 inputs streamed natively (half the HBM traffic), f32 accumulation.
    pred_bf16 = pred.astype(jnp.bfloat16)
    target_bf16 = target.astype(jnp.bfloat16)
    ref_bf16 = jax.block_until_ready(_reference_loss(pred_bf16, target_bf16))
    out_bf16 = jax.block_until_ready(
        bce_with_iou_and_ssim_loss(pred_bf16, target_bf16, tile_rows=1024))
    assert jnp.allclose(out_bf16, ref_bf16, rtol=2e-4, atol=2e-5), (out_bf16, ref_bf16)

    print("KERNEL_OK")
</pallas_src>

<mosaic_0001>
module attributes {stable_mosaic.version = 11 : i64} {
  func.func @kernel(%arg0: i32, %arg1: i32, %arg2: i32, %arg3: memref<1x32x128xf32, #tpu.memory_space<vmem>>, %arg4: memref<1x32x128xf32, #tpu.memory_space<vmem>>, %arg5: memref<1x3x8x128xf32, #tpu.memory_space<vmem>>) attributes {dimension_semantics = [#tpu.dimension_semantics<parallel>, #tpu.dimension_semantics<parallel>, #tpu.dimension_semantics<arbitrary>], iteration_bounds = array<i64: 1, 2, 1>, scalar_prefetch = 0 : i64, scratch_operands = 0 : i64, tpu.core_type = #tpu.core_type<tc>, window_params = [{transform_indices = @transform_0, window_bounds = array<i64: 1, 32, 128>}, {transform_indices = @transform_1, window_bounds = array<i64: 1, 32, 128>}, {transform_indices = @transform_2, window_bounds = array<i64: 1, 3, 8, 128>}]} {
    %c0_i32 = arith.constant 0 : i32
    %0 = arith.cmpi eq, %arg2, %c0_i32 : i32
    %1 = arith.extui %0 : i1 to i32
    %c0_i32_0 = arith.constant 0 : i32
    %2 = arith.cmpi ne, %1, %c0_i32_0 : i32
    scf.if %2 {
      %cst_36 = arith.constant 0.000000e+00 : f32
      %52 = vector.broadcast %cst_36 : f32 to vector<1x3x8x128xf32>
      %c0_37 = arith.constant 0 : index
      %c0_38 = arith.constant 0 : index
      %c0_39 = arith.constant 0 : index
      %c0_40 = arith.constant 0 : index
      %53 = vector.load %arg5[%c0_37, %c0_38, %c0_39, %c0_40] : memref<1x3x8x128xf32, #tpu.memory_space<vmem>>, vector<1x3x8x128xf32>
      tpu.vector_store %arg5[%c0_37, %c0_38, %c0_39, %c0_40], %52 {strides = array<i32>} : memref<1x3x8x128xf32, #tpu.memory_space<vmem>>, vector<1x3x8x128xf32>,
    } else {
    }
    %c0 = arith.constant 0 : index
    %c0_1 = arith.constant 0 : index
    %c0_2 = arith.constant 0 : index
    %3 = vector.load %arg3[%c0, %c0_1, %c0_2] : memref<1x32x128xf32, #tpu.memory_space<vmem>>, vector<1x32x128xf32>
    %4 = vector.shape_cast %3 : vector<1x32x128xf32> to vector<32x128xf32>
    %c0_3 = arith.constant 0 : index
    %c0_4 = arith.constant 0 : index
    %c0_5 = arith.constant 0 : index
    %5 = vector.load %arg4[%c0_3, %c0_4, %c0_5] : memref<1x32x128xf32, #tpu.memory_space<vmem>>, vector<1x32x128xf32>
    %6 = vector.shape_cast %5 : vector<1x32x128xf32> to vector<32x128xf32>
    %cst = arith.constant 0.000000e+00 : f32
    %7 = vector.broadcast %cst : f32 to vector<32x128xf32>
    %8 = arith.subf %7, %4 : vector<32x128xf32>
    %9 = math.exp %8 : vector<32x128xf32>
    %cst_6 = arith.constant 1.000000e+00 : f32
    %10 = vector.broadcast %cst_6 : f32 to vector<32x128xf32>
    %11 = arith.addf %10, %9 : vector<32x128xf32>
    %cst_7 = arith.constant 1.000000e+00 : f32
    %12 = vector.broadcast %cst_7 : f32 to vector<32x128xf32>
    %13 = arith.divf %12, %11 : vector<32x128xf32>
    %14 = arith.mulf %13, %6 : vector<32x128xf32>
    %15 = arith.addf %13, %6 : vector<32x128xf32>
    %cst_8 = arith.constant 0.000000e+00 : f32
    %16 = vector.broadcast %cst_8 : f32 to vector<32x128xf32>
    %17 = arith.maximumf %4, %16 : vector<32x128xf32>
    %18 = arith.mulf %4, %6 : vector<32x128xf32>
    %19 = arith.subf %17, %18 : vector<32x128xf32>
    %20 = math.absf %4 : vector<32x128xf32>
    %cst_9 = arith.constant 0.000000e+00 : f32
    %21 = vector.broadcast %cst_9 : f32 to vector<32x128xf32>
    %22 = arith.subf %21, %20 : vector<32x128xf32>
    %23 = math.exp %22 : vector<32x128xf32>
    %cst_10 = arith.constant 1.000000e+00 : f32
    %24 = vector.broadcast %cst_10 : f32 to vector<32x128xf32>
    %25 = arith.addf %24, %23 : vector<32x128xf32>
    %26 = math.log %25 : vector<32x128xf32>
    %27 = arith.addf %19, %26 : vector<32x128xf32>
    %c0_11 = arith.constant 0 : index
    %c0_12 = arith.constant 0 : index
    %c0_13 = arith.constant 0 : index
    %c0_14 = arith.constant 0 : index
    %28 = vector.load %arg5[%c0_11, %c0_12, %c0_13, %c0_14] : memref<1x3x8x128xf32, #tpu.memory_space<vmem>>, vector<1x1x8x128xf32>
    %29 = vector.shape_cast %28 : vector<1x1x8x128xf32> to vector<8x128xf32>
    %30 = vector.shape_cast %14 : vector<32x128xf32> to vector<4x8x128xf32>
    %cst_15 = arith.constant dense<0.000000e+00> : vector<8x128xf32>
    %31 = vector.multi_reduction <add>, %30, %cst_15 [0] : vector<4x8x128xf32> to vector<8x128xf32>
    %32 = arith.addf %29, %31 : vector<8x128xf32>
    %c0_16 = arith.constant 0 : index
    %c0_17 = arith.constant 0 : index
    %c0_18 = arith.constant 0 : index
    %c0_19 = arith.constant 0 : index
    %33 = vector.load %arg5[%c0_16, %c0_17, %c0_18, %c0_19] : memref<1x3x8x128xf32, #tpu.memory_space<vmem>>, vector<1x1x8x128xf32>
    %34 = vector.shape_cast %33 : vector<1x1x8x128xf32> to vector<8x128xf32>
    %35 = vector.shape_cast %32 : vector<8x128xf32> to vector<1x1x8x128xf32>
    tpu.vector_store %arg5[%c0_16, %c0_17, %c0_18, %c0_19], %35 {strides = array<i32>} : memref<1x3x8x128xf32, #tpu.memory_space<vmem>>, vector<1x1x8x128xf32>,
    %c0_20 = arith.constant 0 : index
    %c1 = arith.constant 1 : index
    %c0_21 = arith.constant 0 : index
    %c0_22 = arith.constant 0 : index
    %36 = vector.load %arg5[%c0_20, %c1, %c0_21, %c0_22] : memref<1x3x8x128xf32, #tpu.memory_space<vmem>>, vector<1x1x8x128xf32>
    %37 = vector.shape_cast %36 : vector<1x1x8x128xf32> to vector<8x128xf32>
    %38 = vector.shape_cast %15 : vector<32x128xf32> to vector<4x8x128xf32>
    %cst_23 = arith.constant dense<0.000000e+00> : vector<8x128xf32>
    %39 = vector.multi_reduction <add>, %38, %cst_23 [0] : vector<4x8x128xf32> to vector<8x128xf32>
    %40 = arith.addf %37, %39 : vector<8x128xf32>
    %c0_24 = arith.constant 0 : index
    %c1_25 = arith.constant 1 : index
    %c0_26 = arith.constant 0 : index
    %c0_27 = arith.constant 0 : index
    %41 = vector.load %arg5[%c0_24, %c1_25, %c0_26, %c0_27] : memref<1x3x8x128xf32, #tpu.memory_space<vmem>>, vector<1x1x8x128xf32>
    %42 = vector.shape_cast %41 : vector<1x1x8x128xf32> to vector<8x128xf32>
    %43 = vector.shape_cast %40 : vector<8x128xf32> to vector<1x1x8x128xf32>
    tpu.vector_store %arg5[%c0_24, %c1_25, %c0_26, %c0_27], %43 {strides = array<i32>} : memref<1x3x8x128xf32, #tpu.memory_space<vmem>>, vector<1x1x8x128xf32>,
    %c0_28 = arith.constant 0 : index
    %c2 = arith.constant 2 : index
    %c0_29 = arith.constant 0 : index
    %c0_30 = arith.constant 0 : index
    %44 = vector.load %arg5[%c0_28, %c2, %c0_29, %c0_30] : memref<1x3x8x128xf32, #tpu.memory_space<vmem>>, vector<1x1x8x128xf32>
    %45 = vector.shape_cast %44 : vector<1x1x8x128xf32> to vector<8x128xf32>
    %46 = vector.shape_cast %27 : vector<32x128xf32> to vector<4x8x128xf32>
    %cst_31 = arith.constant dense<0.000000e+00> : vector<8x128xf32>
    %47 = vector.multi_reduction <add>, %46, %cst_31 [0] : vector<4x8x128xf32> to vector<8x128xf32>
    %48 = arith.addf %45, %47 : vector<8x128xf32>
    %c0_32 = arith.constant 0 : index
    %c2_33 = arith.constant 2 : index
    %c0_34 = arith.constant 0 : index
    %c0_35 = arith.constant 0 : index
    %49 = vector.load %arg5[%c0_32, %c2_33, %c0_34, %c0_35] : memref<1x3x8x128xf32, #tpu.memory_space<vmem>>, vector<1x1x8x128xf32>
    %50 = vector.shape_cast %49 : vector<1x1x8x128xf32> to vector<8x128xf32>
    %51 = vector.shape_cast %48 : vector<8x128xf32> to vector<1x1x8x128xf32>
    tpu.vector_store %arg5[%c0_32, %c2_33, %c0_34, %c0_35], %51 {strides = array<i32>} : memref<1x3x8x128xf32, #tpu.memory_space<vmem>>, vector<1x1x8x128xf32>,
    return
  }
  func.func @transform_0(%arg0: i32, %arg1: i32, %arg2: i32) -> (i32, i32, i32) {
    %c1_i32 = arith.constant 1 : i32
    %0 = arith.muli %arg0, %c1_i32 : i32
    %1 = arith.addi %0, %arg2 : i32
    %c0_i32 = arith.constant 0 : i32
    %c0_i32_0 = arith.constant 0 : i32
    return %arg1, %1, %c0_i32 : i32, i32, i32
  }
  func.func @transform_1(%arg0: i32, %arg1: i32, %arg2: i32) -> (i32, i32, i32) {
    %c1_i32 = arith.constant 1 : i32
    %0 = arith.muli %arg0, %c1_i32 : i32
    %1 = arith.addi %0, %arg2 : i32
    %c0_i32 = arith.constant 0 : i32
    %c0_i32_0 = arith.constant 0 : i32
    return %arg1, %1, %c0_i32 : i32, i32, i32
  }
  func.func @transform_2(%arg0: i32, %arg1: i32, %arg2: i32) -> (i32, i32, i32, i32) {
    %c2_i32 = arith.constant 2 : i32
    %0 = arith.muli %arg0, %c2_i32 : i32
    %1 = arith.addi %0, %arg1 : i32
    %c0_i32 = arith.constant 0 : i32
    %c0_i32_0 = arith.constant 0 : i32
    %c0_i32_1 = arith.constant 0 : i32
    %c0_i32_2 = arith.constant 0 : i32
    return %1, %c0_i32, %c0_i32_0, %c0_i32_1 : i32, i32, i32, i32
  }
}

</mosaic_0001>

<bundles_post_ra>
// kernel: bce_with_iou_and_ssim_loss.1
= control target key start
LH: loop header
LB: loop body
LE: loop exit
PB: predicated region body
PF: predicated region fallthrough
CT: control target
= control target key end

     0   :  { %s562_s9 = smov 0   ;;  %s564_s10 = smov 0   ;;  %s630_s0 = inlined_call_operand.vmem [shape: f32[2,32,128], index: 0, kind: input, shape index: {}]   ;;  %s631_s1 = inlined_call_operand.vmem [shape: f32[2,32,128], index: 1, kind: input, shape index: {}]   ;;  %s632_s2 = inlined_call_operand.vmem [shape: f32[2,3,8,128], index: 2, kind: output, shape index: {}]  }
   0x1   :  { %s566_s11 = smov 0  }
   0x2 LB: > { %s27_s12 = sadd.s32 1, %s541_s10  ;;  %p451_p0 = scmp.ge.s32.totalorder %s545_s11, 1  ;;  %s545_s11 = sphi %s566_s11, %s12_s11   ;;  %s541_s10 = sphi %s564_s10, %s634_s10   ;;  %s537_s9 = sphi %s562_s9, %s633_s9  }
   0x3   : > { %p29_p1 = scmp.ge.s32.totalorder %s27_s12, 2  ;;  %p167_p2 = scmp.lt.s32.totalorder %s545_s11, 3 }
   0x5   : > { %s636_s12 = smov (%p29_p1, %s27_s12), 0  ;;  %p168_p3 = pnand %p451_p0, %p167_p2 }
   0x6   : > { %p208_p4 = scmp.lt.s32.totalorder (!%p168_p3), %s537_s9, 1 }
   0x7   : > { %171 = sbr.rel (%p168_p3) target bundleno = 62 (0x3e), region = 28 }
   0xe   : > { %s638_s9 = smov (!%p208_p4, %s537_s9), 1 }
   0xf   : > { %s463_s13 = sshll.u32 %s638_s9, 5  ;;  %s465_s20 = smul.u32 24, %s638_s9 }
  0x10   : > { %s215_s16 = scalar_lea.vmem %s630_s0, %s463_s13  ;;  %s227_s19 = scalar_lea.vmem %s631_s1, %s463_s13 }
  0x11   : > { %v588_v0 = vld [vmem:[%s215_s16] sm:$0xff]  ;;  %v590_v1 = vld [vmem:[%s215_s16 + $0x8] sm:$0xff]  ;;  %v592_v2 = vld [vmem:[%s215_s16 + $0x10] sm:$0xff]  ;;  %s236_s23 = scalar_lea.vmem %s632_s2, %s465_s20 }
  0x12   : > { %v594_v3 = vld [vmem:[%s215_s16 + $0x18] sm:$0xff]  ;;  %v254_v4 = vsub.f32 0.0, %v588_v0  ;;  %v255_v5 = vsub.f32 0.0, %v590_v1  ;;  %v256_v6 = vsub.f32 0.0, %v592_v2  ;;  %v298_v12 = vand.u32 2147483647, %v588_v0 }
  0x13   : > { %v257_v7 = vsub.f32 0.0, %v594_v3  ;;  %v299_v13 = vand.u32 2147483647, %v590_v1  ;;  %v300_v14 = vand.u32 2147483647, %v592_v2  ;;  %v250_v40 = vld [vmem:[%s227_s19] sm:$0xff] }
  0x14   : > { %v258_v8 = vmul.f32 1.442695, %v254_v4  ;;  %v260_v9 = vmul.f32 1.442695, %v255_v5  ;;  %v262_v10 = vmul.f32 1.442695, %v256_v6  ;;  %v290_v54 = vmul.f32 %v250_v40, %v588_v0 }
  0x15   : > { %v264_v11 = vmul.f32 1.442695, %v257_v7  ;;  %v301_v15 = vand.u32 2147483647, %v594_v3  ;;  %v302_v16 = vsub.f32 0.0, %v298_v12  ;;  %v303_v17 = vsub.f32 0.0, %v299_v13 }
  0x16   : > { %491 = vpow2.f32 %v258_v8  ;;  %v304_v18 = vsub.f32 0.0, %v300_v14  ;;  %v251_v42 = vld [vmem:[%s227_s19 + $0x8] sm:$0xff]  ;;  %v252_v43 = vld [vmem:[%s227_s19 + $0x10] sm:$0xff]  ;;  %v286_v47 = vmax.f32 %v588_v0, 0.0  ;;  %v287_v48 = vmax.f32 %v590_v1, 0.0  ;;  %v253_v50 = vld [vmem:[%s227_s19 + $0x18] sm:$0xff] }
  0x17   : > { %493 = vpow2.f32 %v260_v9  ;;  %v305_v19 = vsub.f32 0.0, %v301_v15  ;;  %v306_v20 = vmul.f32 1.442695, %v302_v16  ;;  %v308_v21 = vmul.f32 1.442695, %v303_v17 }
  0x18   : > { %495 = vpow2.f32 %v262_v10  ;;  %v310_v22 = vmul.f32 1.442695, %v304_v18  ;;  %v288_v53 = vmax.f32 %v592_v2, 0.0  ;;  %v291_v58 = vmul.f32 %v251_v42, %v590_v1 }
  0x19   : > { %497 = vpow2.f32 %v264_v11  ;;  %v312_v23 = vmul.f32 1.442695, %v305_v19  ;;  %v292_v59 = vmul.f32 %v252_v43, %v592_v2  ;;  %v289_v4 = vmax.f32 %v594_v3, 0.0 }
  0x1a   : > { %499 = vpow2.f32 %v306_v20  ;;  %v293_v5 = vmul.f32 %v253_v50, %v594_v3  ;;  %v294_v8 = vsub.f32 %v286_v47, %v290_v54  ;;  %v295_v9 = vsub.f32 %v287_v48, %v291_v58 }
  0x1b   : > { %501 = vpow2.f32 %v308_v21  ;;  %v296_v1 = vsub.f32 %v288_v53, %v292_v59 }
  0x1c   : > { %503 = vpow2.f32 %v310_v22  ;;  %v297_v14 = vsub.f32 %v289_v4, %v293_v5 }
  0x1d   : > { %505 = vpow2.f32 %v312_v23 }
  0x20   : > { %v492_v24 = vpop.eup %491 }
  0x21   : > { %v494_v25 = vpop.eup %493  ;;  %v266_v26 = vadd.f32 1.0, %v492_v24 }
  0x22   : > { %v496_v27 = vpop.eup %495  ;;  %v267_v28 = vadd.f32 1.0, %v494_v25 }
  0x23   : > { %v498_v29 = vpop.eup %497  ;;  %v268_v30 = vadd.f32 1.0, %v496_v27  ;;  %507 = vrcp.f32 %v266_v26 }
  0x24   : > { %v269_v31 = vadd.f32 1.0, %v498_v29  ;;  %509 = vrcp.f32 %v267_v28  ;;  %v500_v32 = vpop.eup %499 }
  0x25   : > { %511 = vrcp.f32 %v268_v30  ;;  %v502_v33 = vpop.eup %501  ;;  %v314_v34 = vadd.f32 1.0, %v500_v32 }
  0x26   : > { %513 = vrcp.f32 %v269_v31  ;;  %v504_v35 = vpop.eup %503  ;;  %v315_v36 = vadd.f32 1.0, %v502_v33 }
  0x27   : > { %v506_v37 = vpop.eup %505  ;;  %v316_v38 = vadd.f32 1.0, %v504_v35  ;;  %515 = vlog2.f32 %v314_v34 }
  0x28   : > { %v317_v39 = vadd.f32 1.0, %v506_v37  ;;  %517 = vlog2.f32 %v315_v36 }
  0x29   : > { %519 = vlog2.f32 %v316_v38 }
  0x2a   : > { %521 = vlog2.f32 %v317_v39 }
  0x2d   : > { %v508_v41 = vpop.eup %507 }
  0x2e   : > { %v510_v44 = vpop.eup %509  ;;  %v278_v45 = vmul.f32 %v508_v41, %v250_v40  ;;  %v282_v46 = vadd.f32 %v508_v41, %v250_v40 }
  0x2f   : > { %v512_v49 = vpop.eup %511  ;;  %v279_v51 = vmul.f32 %v510_v44, %v251_v42  ;;  %v283_v52 = vadd.f32 %v510_v44, %v251_v42 }
  0x30   : > { %v514_v55 = vpop.eup %513  ;;  %v280_v56 = vmul.f32 %v512_v49, %v252_v43  ;;  %v284_v57 = vadd.f32 %v512_v49, %v252_v43 }
  0x31   : > { %v281_v60 = vmul.f32 %v514_v55, %v253_v50  ;;  %v331_v61 = vadd.f32 %v279_v51, %v278_v45  ;;  %v285_v62 = vadd.f32 %v514_v55, %v253_v50  ;;  %v338_v63 = vadd.f32 %v283_v52, %v282_v46  ;;  %v516_v0 = vpop.eup %515 }
  0x32   : > { %v518_v10 = vpop.eup %517  ;;  %v319_v13 = vmul.f32 0.6931472, %v516_v0 }
  0x33   : > { %v332_v6 = vadd.f32 %v331_v61, %v280_v56  ;;  %v339_v7 = vadd.f32 %v338_v63, %v284_v57  ;;  %v520_v2 = vpop.eup %519  ;;  %v321_v15 = vmul.f32 0.6931472, %v518_v10 }
  0x34   : > { %v522_v16 = vpop.eup %521  ;;  %v323_v17 = vmul.f32 0.6931472, %v520_v2  ;;  %v326_v3 = vadd.f32 %v319_v13, %v294_v8 }
  0x35   : > { %v333_v11 = vadd.f32 %v332_v6, %v281_v60  ;;  %v340_v12 = vadd.f32 %v339_v7, %v285_v62  ;;  %v325_v18 = vmul.f32 0.6931472, %v522_v16  ;;  %v327_v19 = vadd.f32 %v321_v15, %v295_v9 }
  0x36   : > { %v328_v20 = vadd.f32 %v323_v17, %v296_v1 }
  0x37   : > { %335 = vst [vmem:[%s236_s23] sm:$0xff] %v333_v11  ;;  %458 = vst [vmem:[%s236_s23 + $0x8] sm:$0xff] %v340_v12  ;;  %v329_v21 = vadd.f32 %v325_v18, %v297_v14  ;;  %v345_v22 = vadd.f32 %v327_v19, %v326_v3 }
  0x39   : > { %v346_v23 = vadd.f32 %v345_v22, %v328_v20 }
  0x3b   : > { %v347_v24 = vadd.f32 %v346_v23, %v329_v21 }
  0x3d   : > { %460 = vst [vmem:[%s236_s23 + $0x10] sm:$0xff] %v347_v24 }
  0x3e PF: > { %s12_s11 = sadd.s32 1, %s545_s11   ;;  %s633_s9 = smov %s541_s10 }
  0x3f   : > { %p9_p5 = scmp.ge.s32.totalorder %s12_s11, 4   ;;  %s634_s10 = smov %s636_s12 }
  0x41   :  { %11 = sbr.rel (!%p9_p5) target bundleno = 2 (0x2), region = 67 }

</bundles_post_ra>
